<compile_context>
chip_gen: v7x
topology: tpu7x:2x2x1
jax: 0.10.0
libtpu: 0.0.40
codegen_flags: <defaults>
</compile_context>

<pallas_src>
import jax
import jax.numpy as jnp
from jax.experimental import pallas as pl
from jax.experimental.pallas import tpu as pltpu

STRIDE = 2
PADDING = 10
H_IN, W_IN = 4, 4
H_OUT = (H_IN + 2 * PADDING - 1) // STRIDE + 1   # 12
W_OUT = (W_IN + 2 * PADDING - 1) // STRIDE + 1   # 12

# Static (output_index, input_index) pairs where the conv actually touches x.
VALID_H = [(oh, oh * STRIDE - PADDING) for oh in range(H_OUT)
           if 0 <= oh * STRIDE - PADDING < H_IN]          # [(5, 0), (6, 2)]
VALID_W = [(ow, ow * STRIDE - PADDING) for ow in range(W_OUT)
           if 0 <= ow * STRIDE - PADDING < W_IN]          # [(5, 0), (6, 2)]


def conv1x1_strided_kernel(x_ref, w_ref, b_ref, o_ref):
    # x_ref : (H_IN*W_IN,) f32 in SMEM (flattened input image)
    # w_ref : (1,) f32 in SMEM   (conv weight)
    # b_ref : (1,) f32 in SMEM   (conv bias)
    # o_ref : (H_OUT, W_OUT) f32 in VMEM
    w = w_ref[0]
    b = b_ref[0]
    base = b - 1.0                                   # value of every "padding" output element

    row = jax.lax.broadcasted_iota(jnp.int32, (H_OUT, W_OUT), 0)
    col = jax.lax.broadcasted_iota(jnp.int32, (H_OUT, W_OUT), 1)

    # Column compares computed once and reused across all valid rows.
    col_hits = [(col == ow) for ow, _ in VALID_W]

    # `picked` holds the sampled x value at the 4 valid output positions and 0 elsewhere,
    # so a single `base + w * picked` yields the full 12x12 result.
    picked = jnp.zeros((H_OUT, W_OUT), dtype=jnp.float32)
    for oh, ih in VALID_H:
        row_pick = jnp.zeros((H_OUT, W_OUT), dtype=jnp.float32)
        for (ow, iw), chit in zip(VALID_W, col_hits):
            row_pick = jnp.where(chit, x_ref[ih * W_IN + iw], row_pick)
        picked = jnp.where(row == oh, row_pick, picked)

    o_ref[...] = base + w * picked


def model_forward(x_nchw, weight, bias):
    # x_nchw: (1, 1, H_IN, W_IN) f32; weight: (1, 1, 1, 1) f32; bias: (1,) f32
    x_flat = x_nchw.reshape(H_IN * W_IN).astype(jnp.float32)
    w_flat = weight.reshape(1).astype(jnp.float32)
    b_flat = bias.reshape(1).astype(jnp.float32)

    out2d = pl.pallas_call(
        conv1x1_strided_kernel,
        out_shape=jax.ShapeDtypeStruct((H_OUT, W_OUT), jnp.float32),
        in_specs=[
            pl.BlockSpec(memory_space=pltpu.SMEM),    # x, flat 1-D scalar reads
            pl.BlockSpec(memory_space=pltpu.SMEM),    # weight
            pl.BlockSpec(memory_space=pltpu.SMEM),    # bias
        ],
        out_specs=pl.BlockSpec((H_OUT, W_OUT), lambda: (0, 0)),
    )(x_flat, w_flat, b_flat)

    return out2d.reshape(1, 1, H_OUT, W_OUT)


def reference_forward(x_nchw, weight, bias):
    # Pure-JAX reference of the same semantics (pad, stride-2 sample, affine, -1).
    x2d = x_nchw[0, 0]
    xp = jnp.pad(x2d, ((PADDING, PADDING), (PADDING, PADDING)))
    sampled = xp[::STRIDE, ::STRIDE][:H_OUT, :W_OUT]
    out = sampled * weight.reshape(()) + bias.reshape(()) - 1.0
    return out.reshape(1, 1, H_OUT, W_OUT)


if __name__ == "__main__":
    key = jax.random.PRNGKey(0)
    kx, kw, kb = jax.random.split(key, 3)

    # Input matching the module's fixed input: torch.randn(1, 1, 4, 4)
    x4 = jax.random.normal(kx, (1, 1, H_IN, W_IN), dtype=jnp.float32)

    # Deterministic Conv2d(1, 1, 1) parameters: weight (1,1,1,1), bias (1,)
    weight = jax.random.normal(kw, (1, 1, 1, 1), dtype=jnp.float32) * 0.5
    bias = jax.random.normal(kb, (1,), dtype=jnp.float32) * 0.5

    out = model_forward(x4, weight, bias)
    out = jax.block_until_ready(out)

    ref = reference_forward(x4, weight, bias)
    assert out.shape == (1, 1, H_OUT, W_OUT), out.shape
    assert jnp.allclose(out, ref, atol=1e-6, rtol=1e-6), "mismatch vs reference"

    print("KERNEL_OK")
</pallas_src>

<mosaic_0001>
module attributes {stable_mosaic.version = 11 : i64} {
  func.func @conv1x1_strided_kernel(%arg0: memref<16xf32, #tpu.memory_space<smem>>, %arg1: memref<1xf32, #tpu.memory_space<smem>>, %arg2: memref<1xf32, #tpu.memory_space<smem>>, %arg3: memref<12x12xf32, #tpu.memory_space<vmem>>) attributes {dimension_semantics = [], scalar_prefetch = 0 : i64, scratch_operands = 0 : i64, tpu.core_type = #tpu.core_type<tc>} {
    %c0 = arith.constant 0 : index
    %0 = memref.load %arg1[%c0] : memref<1xf32, #tpu.memory_space<smem>>
    %c0_0 = arith.constant 0 : index
    %1 = memref.load %arg2[%c0_0] : memref<1xf32, #tpu.memory_space<smem>>
    %cst = arith.constant 1.000000e+00 : f32
    %2 = arith.subf %1, %cst : f32
    %3 = tpu.iota {dimensions = array<i32: 0>} : vector<12x12xi32>
    %4 = tpu.iota {dimensions = array<i32: 1>} : vector<12x12xi32>
    %c5_i32 = arith.constant 5 : i32
    %5 = vector.broadcast %c5_i32 : i32 to vector<12x12xi32>
    %6 = arith.cmpi eq, %4, %5 : vector<12x12xi32>
    %c6_i32 = arith.constant 6 : i32
    %7 = vector.broadcast %c6_i32 : i32 to vector<12x12xi32>
    %8 = arith.cmpi eq, %4, %7 : vector<12x12xi32>
    %cst_1 = arith.constant 0.000000e+00 : f32
    %9 = vector.broadcast %cst_1 : f32 to vector<12x12xf32>
    %cst_2 = arith.constant 0.000000e+00 : f32
    %10 = vector.broadcast %cst_2 : f32 to vector<12x12xf32>
    %c0_3 = arith.constant 0 : index
    %11 = memref.load %arg0[%c0_3] : memref<16xf32, #tpu.memory_space<smem>>
    %12 = vector.broadcast %11 : f32 to vector<12x12xf32>
    %13 = arith.select %6, %12, %10 : vector<12x12xi1>, vector<12x12xf32>
    %c2 = arith.constant 2 : index
    %14 = memref.load %arg0[%c2] : memref<16xf32, #tpu.memory_space<smem>>
    %15 = vector.broadcast %14 : f32 to vector<12x12xf32>
    %16 = arith.select %8, %15, %13 : vector<12x12xi1>, vector<12x12xf32>
    %c5_i32_4 = arith.constant 5 : i32
    %17 = vector.broadcast %c5_i32_4 : i32 to vector<12x12xi32>
    %18 = arith.cmpi eq, %3, %17 : vector<12x12xi32>
    %19 = arith.select %18, %16, %9 : vector<12x12xi1>, vector<12x12xf32>
    %cst_5 = arith.constant 0.000000e+00 : f32
    %20 = vector.broadcast %cst_5 : f32 to vector<12x12xf32>
    %c8 = arith.constant 8 : index
    %21 = memref.load %arg0[%c8] : memref<16xf32, #tpu.memory_space<smem>>
    %22 = vector.broadcast %21 : f32 to vector<12x12xf32>
    %23 = arith.select %6, %22, %20 : vector<12x12xi1>, vector<12x12xf32>
    %c10 = arith.constant 10 : index
    %24 = memref.load %arg0[%c10] : memref<16xf32, #tpu.memory_space<smem>>
    %25 = vector.broadcast %24 : f32 to vector<12x12xf32>
    %26 = arith.select %8, %25, %23 : vector<12x12xi1>, vector<12x12xf32>
    %c6_i32_6 = arith.constant 6 : i32
    %27 = vector.broadcast %c6_i32_6 : i32 to vector<12x12xi32>
    %28 = arith.cmpi eq, %3, %27 : vector<12x12xi32>
    %29 = arith.select %28, %26, %19 : vector<12x12xi1>, vector<12x12xf32>
    %30 = vector.broadcast %0 : f32 to vector<12x12xf32>
    %31 = arith.mulf %30, %29 : vector<12x12xf32>
    %32 = vector.broadcast %2 : f32 to vector<12x12xf32>
    %33 = arith.addf %32, %31 : vector<12x12xf32>
    %c0_7 = arith.constant 0 : index
    %c0_8 = arith.constant 0 : index
    %34 = vector.load %arg3[%c0_7, %c0_8] : memref<12x12xf32, #tpu.memory_space<vmem>>, vector<12x12xf32>
    tpu.vector_store %arg3[%c0_7, %c0_8], %33 {strides = array<i32>} : memref<12x12xf32, #tpu.memory_space<vmem>>, vector<12x12xf32>,
    return
  }
}

</mosaic_0001>

<bundles_post_ra>
// kernel: tpu_custom_call.1
= control target key start
LH: loop header
LB: loop body
LE: loop exit
PB: predicated region body
PF: predicated region fallthrough
CT: control target
= control target key end

     0   :  { %10 = vsyncpa [#allocation6], 0  ;;  %s178_s0 = inlined_call_operand.vmem [shape: f32[16], index: 0, kind: input, shape index: {}]   ;;  %s179_s1 = inlined_call_operand.<no memory space> [shape: f32[1], index: 1, kind: input, shape index: {}]   ;;  %s180_s2 = inlined_call_operand.<no memory space> [shape: f32[1], index: 2, kind: input, shape index: {}]   ;;  %s181_s3 = inlined_call_operand.hbm [shape: f32[12,12], index: 3, kind: output, shape index: {}]  }
   0x1   :  { %11 = vsyncpa [#allocation5], 0  ;;  %s18_s14 = sshll.u32 %s178_s0, 4  ;;  %s19_s14 = int_to_ptr.vmem [resolvable:$true] %s18_s14 }
   0x2   :  { %s95_s15 = scalar_lea.vmem %s19_s14, 16  ;;  %p100_p1 = scmp.lt.s32.totalorder %s19_s14, %s19_s14 }
   0x3   :  { %p96_p0 = scmp.ne.s32.totalorder %s19_s14, %s95_s15  ;;  %p101_p2 = scmp.lt.s32.totalorder %s95_s15, %s95_s15 }
   0x5   :  { %p102_p3 = por %p101_p2, %p100_p1 }
   0x7   :  { %p103_p4 = pnand %p102_p3, %p96_p0 }
   0x9   :  { %106 = shalt.err (!%p103_p4)
}
   0xa   :  { %s133_s16 = smov [#allocation4]  }
   0xb   :  { %21 = dma.vmem_to_smem %s19_s14, 16, %s133_s16, [#allocation6]  }
   0xc   :  { %129 = dma.done.wait [#allocation6], 16  }
   0xd   :  { %130 = vsyncadd [#allocation6], 4294967280 }
   0xe   :  { %29 = sfence }
   0xf   :  { %s87_s19 = sadd.f32 -1.0, %s180_s2  ;;  %v33_v0 = vlaneseq  ;;  %s40_s20 = sld [smem:[#allocation4]]  ;;  %v60_v1 = vstv %s179_s1  ;;  %vm68_vm0 = vcmask 93184   ;;  %vm66_vm5 = vcmask 97280  }
  0x10   :  { %s88_s22 = sld [smem:[#allocation4 + $0x2]]  ;;  %s89_s23 = sld [smem:[#allocation4 + $0x8]]  ;;  %v62_v2 = vmul.f32 0.0, %v60_v1 }
  0x11   :  { %v34_v3 = vshrl.u32 %v33_v0, 7  ;;  %v37_v4 = vand.u32 127, %v33_v0  ;;  %s90_s24 = sld [smem:[#allocation4 + $0xa]]  ;;  %v63_v5 = vstv %s87_s19  ;;  %s134_s1 = smov [#allocation7]  }
  0x12   :  { %v65_v6 = vadd.f32 %v63_v5, %v62_v2  ;;  %s75_s2 = sshll.u32 %s134_s1, 4  ;;  %s76_s2 = int_to_ptr.vmem [resolvable:$true] %s75_s2 }
  0x13   :  { %vm38_vm1 = vcmp.eq.s32.totalorder %v37_v4, 5  ;;  %vm39_vm2 = vcmp.eq.s32.totalorder %v37_v4, 6  ;;  %vm46_vm3 = vcmp.eq.s32.totalorder %v34_v3, 5  ;;  %vm56_vm4 = vcmp.eq.s32.totalorder %v34_v3, 6  ;;  %s107_s25 = scalar_lea.vmem %s76_s2, 256  ;;  %p112_p6 = scmp.lt.s32.totalorder %s76_s2, %s76_s2 }
  0x14   :  { %69 = vst.msk [vmem:[#allocation7 + $0x8] sm:$0xf] %vm68_vm0, %v65_v6  ;;  %p108_p5 = scmp.ne.s32.totalorder %s76_s2, %s107_s25  ;;  %p113_p7 = scmp.lt.s32.totalorder %s107_s25, %s107_s25 }
  0x15   :  { %v41_v7 = vstv %s40_s20 }
  0x16   :  { %v42_v8 = vsel %vm38_vm1, %v41_v7, 0.0  ;;  %v44_v9 = vstv %s88_s22  ;;  %v51_v10 = vstv %s89_s23  ;;  %p114_p8 = por %p113_p7, %p112_p6 }
  0x17   :  { %v45_v11 = vsel %vm39_vm2, %v44_v9, %v42_v8  ;;  %v52_v12 = vsel %vm38_vm1, %v51_v10, 0.0  ;;  %v54_v13 = vstv %s90_s24 }
  0x18   :  { %v48_v14 = vsel %vm46_vm3, %v45_v11, 0.0  ;;  %v55_v15 = vsel %vm39_vm2, %v54_v13, %v52_v12  ;;  %p115_p9 = pnand %p114_p8, %p108_p5 }
  0x19   :  { %v58_v16 = vsel %vm56_vm4, %v55_v15, %v48_v14 }
  0x1a   :  { %v61_v17 = vmul.f32 %v60_v1, %v58_v16 }
  0x1c   :  { %v64_v18 = vadd.f32 %v63_v5, %v61_v17 }
  0x1e   :  { %67 = vst.msk [vmem:[#allocation7] sm:$0xff] %vm66_vm5, %v64_v18 }
  0x1f   :  { %118 = shalt.err (!%p115_p9)
}
  0x20   :  { %s119_s28 = scalar_lea.hbm %s181_s3, 256 }
  0x21   :  { %p120_p10 = scmp.ne.s32.totalorder %s181_s3, %s119_s28  ;;  %p123_p11 = scmp.lt.u32.totalorder %s119_s28, %s181_s3 }
  0x23   :  { %p125_p12 = pnand %p123_p11, %p120_p10 }
  0x25   :  { %128 = shalt.err (!%p125_p12)
}
  0x26   :  { %s135_s6 = smov 128   ;;  %s136_s7 = smov 8  }
  0x27   :  { %81 = dma.vmem_to_hbm [thread:$0]  %s76_s2, 256, %s181_s3, [#allocation5], %s135_s6, %s135_s6, %s136_s7  }
  0x28   :  { %131 = dma.done.wait [#allocation5], 256  }
  0x29   :  { %132 = vsyncadd [#allocation5], 4294967040 }
  0x2a   :  { %85 = vsyncpa [#allocation5], 1 }
  0x2b   :  { %86 = vsyncpa [#allocation6], 1 }

</bundles_post_ra>
